<compile_context>
chip_gen: v6e
topology: v6e:2x2x1
jax: 0.10.0
libtpu: 0.0.40
codegen_flags: <defaults>
</compile_context>

<pallas_src>
import math

import jax
import jax.numpy as jnp
from jax.experimental import pallas as pl
from jax.experimental.pallas import tpu as pltpu


# ---------------------------------------------------------------------------
# Kernel body (shared by both layouts): broadcast-add the positional tile
# onto the x tile.  pos broadcasts over the leading/sublane axes.
# ---------------------------------------------------------------------------
def _pos_add_kernel(x_ref, pos_ref, o_ref):
    o_ref[...] = (x_ref[...] + pos_ref[...]).astype(o_ref.dtype)


# ---------------------------------------------------------------------------
# Helpers
# ---------------------------------------------------------------------------
def _sublane(dtype):
    return {1: 32, 2: 16, 4: 8}.get(jnp.dtype(dtype).itemsize, 8)


def _round_up(x, m):
    return ((x + m - 1) // m) * m


def _hw_params():
    """Generation-aware (target tile bytes, vmem_limit_bytes, tensorcores)."""
    target, vmem_limit, cores = 2 << 20, 32 << 20, 1  # safe defaults
    try:
        kind = (jax.devices()[0].device_kind or "").lower()
        if "tpu7" in kind or "7x" in kind or "v7" in kind:
            # v7x: 64 MiB physical VMEM / TC, ~3.2 TB/s HBM, 2 TCs per chip.
            target, vmem_limit, cores = 8 << 20, 48 << 20, 2
        elif "v6" in kind:
            target, vmem_limit, cores = 4 << 20, 64 << 20, 1
        elif "v5p" in kind or "v4" in kind:
            target, vmem_limit, cores = 4 << 20, 64 << 20, 2
        elif "v5" in kind:  # v5e / v5 lite
            target, vmem_limit, cores = 4 << 20, 64 << 20, 1
    except Exception:
        pass
    return target, vmem_limit, cores


def _largest_divisor_tile(extent, unit, max_tile):
    """Largest multiple of `unit` dividing `extent`, <= max_tile (>= unit).

    Returns None when `extent` is not divisible by `unit`.
    """
    if extent <= 0 or extent % unit != 0:
        return None
    best = unit
    cap = min(extent, max(max_tile, unit))
    c = unit
    while c <= cap:
        if extent % c == 0:
            best = c
        c += unit
    return best


def _choose_tiles_2d(B, L, itemsize, sub, target_bytes, vmem_limit, num_cores):
    """Tiles for the flattened (B, S*E) layout. Requires L%128==0, B%sub==0."""
    # Lane (column) tile first: lane-dense stores are the biggest single lever.
    max_tc = max(128, target_bytes // max(1, sub * itemsize))
    tc = _largest_divisor_tile(L, 128, max_tc)
    # Sublane (row) tile: fill the remaining per-tile budget (cap 4096 rows).
    max_tb = max(sub, target_bytes // max(1, tc * itemsize))
    tb = _largest_divisor_tile(B, sub, min(max_tb, 4096))

    # VMEM budget including padding and double buffering:
    #   2x x-tile + 2x out-tile + 2x pos-tile (pos row pads 1 -> sub sublanes).
    def est(tb_, tc_):
        return 2 * tc_ * itemsize * (2 * tb_ + sub)

    while est(tb, tc) > (vmem_limit * 3) // 4:
        if tb > sub and tb % (2 * sub) == 0:
            tb //= 2
        elif tc % 256 == 0:
            tc //= 2
        else:
            break

    # Multi-TensorCore chips (v7x): guarantee >= num_cores grid steps when the
    # array is big enough to be worth splitting across cores.
    if num_cores > 1 and B * L * itemsize > (1 << 20):
        while (B // tb) * (L // tc) < num_cores:
            if tc % 256 == 0:
                tc //= 2
            elif tb % (2 * sub) == 0:
                tb //= 2
            else:
                break
    return tb, tc


def _choose_tiles_3d(B, S, E, itemsize, sub, target_bytes, vmem_limit, num_cores):
    """Tiles for the (B, S, E) layout: seq on sublanes, emb on lanes."""
    # Lane dim: tile E only when 128-divisible and too big for one strip;
    # otherwise ship it at full extent (always legal, padded to 128 lanes).
    if E % 128 == 0 and E * sub * itemsize > target_bytes:
        te = _largest_divisor_tile(E, 128, max(128, target_bytes // (sub * itemsize)))
    else:
        te = E
    pad_te = _round_up(te, 128)

    # Sublane dim: multiples of `sub` dividing S; full extent fallback.
    ts = _largest_divisor_tile(S, sub, max(sub, target_bytes // max(1, pad_te * itemsize)))
    if ts is None:
        # TODO(synk): for huge S that is not sublane-divisible, pad S in the
        # wrapper instead of shipping the full extent.
        ts = S
    pad_ts = _round_up(ts, sub)

    # Leading (batch) dim: no hardware tiling constraint, just budget.
    max_tb = max(1, target_bytes // max(1, pad_ts * pad_te * itemsize))
    tb = _largest_divisor_tile(B, 1, min(max_tb, 1024))

    # Padded, double-buffered VMEM estimate: x + out tiles + pos tile.
    def est(tb_, ts_, te_):
        pts, pte = _round_up(ts_, sub), _round_up(te_, 128)
        return 2 * pts * pte * itemsize * (2 * tb_ + 1)

    while est(tb, ts, te) > (vmem_limit * 3) // 4:
        if tb > 1:
            tb = tb // 2 if tb % 2 == 0 else 1
        elif ts % (2 * sub) == 0:
            ts //= 2
        elif te % 256 == 0:
            te //= 2
        else:
            break

    if num_cores > 1 and B * S * E * itemsize > (1 << 20):
        while (B // tb) * (S // ts) * (E // te) < num_cores:
            if tb > 1 and tb % 2 == 0:
                tb //= 2
            elif ts % (2 * sub) == 0:
                ts //= 2
            elif te % 256 == 0:
                te //= 2
            else:
                break
    return tb, ts, te


# ---------------------------------------------------------------------------
# Forward
# ---------------------------------------------------------------------------
def pos_embedding_forward(x, pos_emb):
    """x: (..., S, E), pos_emb: (max_len, E) with S <= max_len.

    Computes x + pos_emb[:S] with PyTorch-style type promotion
    (result dtype = result_type(x.dtype, pos_emb.dtype)).
    """
    assert x.ndim >= 2, "x must have at least (seq, emb) dims"
    *lead, S, E = x.shape
    max_len, E2 = pos_emb.shape
    assert E == E2, "emb_dim mismatch"
    assert S <= max_len, "sequence longer than max_len"

    B = 1
    for d in lead:
        B *= d
    L = S * E

    out_dtype = jnp.result_type(x.dtype, pos_emb.dtype)
    # One-time parameter prep: slice + cast (no per-grid-step cast / DMA waste).
    pos = pos_emb[:S].astype(out_dtype)

    x_itemsize = jnp.dtype(x.dtype).itemsize
    out_itemsize = jnp.dtype(out_dtype).itemsize
    itemsize = max(x_itemsize, out_itemsize)
    sub = max(_sublane(x.dtype), _sublane(out_dtype))

    target_bytes, vmem_limit, num_cores = _hw_params()

    cost = pl.CostEstimate(
        flops=B * L,
        transcendentals=0,
        bytes_accessed=B * L * (x_itemsize + out_itemsize) + L * out_itemsize,
    )
    # Write the output into x's buffer when dtypes match (free; no extra HBM alloc).
    io_alias = {0: 0} if x.dtype == out_dtype else {}

    if L % 128 == 0 and B % sub == 0:
        # ---------------- Path A: lane-dense (B, S*E) flatten ---------------
        x2d = x.reshape(B, L)
        pos2d = pos.reshape(1, L)
        tb, tc = _choose_tiles_2d(B, L, itemsize, sub, target_bytes, vmem_limit, num_cores)
        # Column axis outermost, row axis innermost: the pos tile (indexed only
        # by the column tile) stays VMEM-resident across the entire batch axis.
        grid = (L // tc, B // tb)
        out2d = pl.pallas_call(
            _pos_add_kernel,
            out_shape=jax.ShapeDtypeStruct((B, L), out_dtype),
            grid_spec=pltpu.PrefetchScalarGridSpec(
                num_scalar_prefetch=0,
                grid=grid,
                in_specs=[
                    pl.BlockSpec((tb, tc), lambda c, r: (r, c)),
                    pl.BlockSpec((1, tc), lambda c, r: (0, c)),
                ],
                out_specs=pl.BlockSpec((tb, tc), lambda c, r: (r, c)),
            ),
            compiler_params=pltpu.CompilerParams(
                dimension_semantics=("parallel", "parallel"),
                vmem_limit_bytes=vmem_limit,
            ),
            cost_estimate=cost,
            input_output_aliases=io_alias,
        )(x2d, pos2d)
        return out2d.reshape(*lead, S, E)

    # ------------- Path B: (B, S, E) blocking (small B / ragged L) ----------
    x3d = x.reshape(B, S, E)
    tb, ts, te = _choose_tiles_3d(B, S, E, itemsize, sub, target_bytes, vmem_limit, num_cores)
    grid = (S // ts, E // te, B // tb)  # batch innermost -> pos stays resident
    out3d = pl.pallas_call(
        _pos_add_kernel,
        out_shape=jax.ShapeDtypeStruct((B, S, E), out_dtype),
        grid_spec=pltpu.PrefetchScalarGridSpec(
            num_scalar_prefetch=0,
            grid=grid,
            in_specs=[
                pl.BlockSpec((tb, ts, te), lambda s, e, b: (b, s, e)),
                pl.BlockSpec((ts, te), lambda s, e, b: (s, e)),
            ],
            out_specs=pl.BlockSpec((tb, ts, te), lambda s, e, b: (b, s, e)),
        ),
        compiler_params=pltpu.CompilerParams(
            dimension_semantics=("parallel", "parallel", "parallel"),
            vmem_limit_bytes=vmem_limit,
        ),
        cost_estimate=cost,
        input_output_aliases=io_alias,
    )(x3d, pos)
    return out3d.reshape(*lead, S, E)


def init_pos_emb(key, max_len, emb_dim, dtype=jnp.float32):
    """kaiming_uniform_(a=sqrt(5)) equivalent for a (max_len, emb_dim) tensor.

    fan_in = emb_dim, gain = sqrt(2/(1+5)) = sqrt(1/3),
    bound = gain * sqrt(3/fan_in) = 1/sqrt(fan_in).
    """
    bound = 1.0 / math.sqrt(emb_dim)
    return jax.random.uniform(
        key, (max_len, emb_dim), dtype=dtype, minval=-bound, maxval=bound
    )


if __name__ == "__main__":
    key = jax.random.PRNGKey(0)
    k_x, k_p, k_x2, k_x3 = jax.random.split(key, 4)

    batch, seq, emb_dim, max_len = 2, 8, 32, 16
    pos_emb = init_pos_emb(k_p, max_len, emb_dim, dtype=jnp.float32)

    # Case 1: small leading dim -> 3-D (batch, seq, emb) blocking path.
    x = jax.random.normal(k_x, (batch, seq, emb_dim), dtype=jnp.float32)
    ref = x + pos_emb[:seq][None, :, :]           # computed before the kernel call
    out = jax.block_until_ready(pos_embedding_forward(x, pos_emb))
    assert out.shape == x.shape and out.dtype == ref.dtype
    assert jnp.allclose(out, ref, atol=1e-6), "mismatch vs reference (3D, small batch)"

    # Case 2: no leading dims, x of shape (seq, emb).
    x2 = jax.random.normal(k_x2, (seq, emb_dim), dtype=jnp.float32)
    ref2 = x2 + pos_emb[:seq]
    out2 = jax.block_until_ready(pos_embedding_forward(x2, pos_emb))
    assert out2.shape == x2.shape
    assert jnp.allclose(out2, ref2, atol=1e-6), "mismatch vs reference (2D)"

    # Case 3: batch large enough for the lane-dense flattened (B, S*E) path.
    x3 = jax.random.normal(k_x3, (16, seq, emb_dim), dtype=jnp.float32)
    ref3 = x3 + pos_emb[:seq][None, :, :]
    out3 = jax.block_until_ready(pos_embedding_forward(x3, pos_emb))
    assert out3.shape == x3.shape
    assert jnp.allclose(out3, ref3, atol=1e-6), "mismatch vs reference (flattened path)"

    print("KERNEL_OK")
</pallas_src>

<mosaic_0001>
module attributes {stable_mosaic.version = 11 : i64} {
  func.func @_pos_add_kernel(%arg0: i32, %arg1: i32, %arg2: i32, %arg3: memref<2x8x32xf32, #tpu.memory_space<vmem>>, %arg4: memref<8x32xf32, #tpu.memory_space<vmem>>, %arg5: memref<2x8x32xf32, #tpu.memory_space<vmem>>) attributes {dimension_semantics = [#tpu.dimension_semantics<parallel>, #tpu.dimension_semantics<parallel>, #tpu.dimension_semantics<parallel>], iteration_bounds = array<i64: 1, 1, 1>, scalar_prefetch = 0 : i64, scratch_operands = 0 : i64, tpu.core_type = #tpu.core_type<tc>, window_params = [{transform_indices = @transform_0, window_bounds = array<i64: 2, 8, 32>}, {transform_indices = @transform_1, window_bounds = array<i64: 8, 32>}, {transform_indices = @transform_2, window_bounds = array<i64: 2, 8, 32>}]} {
    %c0 = arith.constant 0 : index
    %c0_0 = arith.constant 0 : index
    %c0_1 = arith.constant 0 : index
    %0 = vector.load %arg3[%c0, %c0_0, %c0_1] : memref<2x8x32xf32, #tpu.memory_space<vmem>>, vector<2x8x32xf32>
    %c0_2 = arith.constant 0 : index
    %c0_3 = arith.constant 0 : index
    %1 = vector.load %arg4[%c0_2, %c0_3] : memref<8x32xf32, #tpu.memory_space<vmem>>, vector<8x32xf32>
    %2 = vector.shape_cast %1 : vector<8x32xf32> to vector<1x8x32xf32>
    %3 = vector.broadcast %2 : vector<1x8x32xf32> to vector<2x8x32xf32>
    %4 = arith.addf %0, %3 : vector<2x8x32xf32>
    %c0_4 = arith.constant 0 : index
    %c0_5 = arith.constant 0 : index
    %c0_6 = arith.constant 0 : index
    %5 = vector.load %arg5[%c0_4, %c0_5, %c0_6] : memref<2x8x32xf32, #tpu.memory_space<vmem>>, vector<2x8x32xf32>
    tpu.vector_store %arg5[%c0_4, %c0_5, %c0_6], %4 {strides = array<i32>} : memref<2x8x32xf32, #tpu.memory_space<vmem>>, vector<2x8x32xf32>,
    return
  }
  func.func @transform_0(%arg0: i32, %arg1: i32, %arg2: i32) -> (i32, i32, i32) {
    %c0_i32 = arith.constant 0 : i32
    return %arg2, %arg0, %arg1 : i32, i32, i32
  }
  func.func @transform_1(%arg0: i32, %arg1: i32, %arg2: i32) -> (i32, i32) {
    %c0_i32 = arith.constant 0 : i32
    return %arg0, %arg1 : i32, i32
  }
  func.func @transform_2(%arg0: i32, %arg1: i32, %arg2: i32) -> (i32, i32, i32) {
    %c0_i32 = arith.constant 0 : i32
    return %arg2, %arg0, %arg1 : i32, i32, i32
  }
}

</mosaic_0001>

<bundles_post_ra>
// kernel: tpu_custom_call.1
= control target key start
LH: loop header
LB: loop body
LE: loop exit
PB: predicated region body
PF: predicated region fallthrough
CT: control target
= control target key end

     0   :  { %7 = vsyncpa [#allocation3], 0  ;;  %s127_s0 = inlined_call_operand.hbm [shape: f32[2,8,32], index: 0, kind: input, shape index: {}, may-alias: {0,2}]   ;;  %s128_s1 = inlined_call_operand.vmem [shape: f32[8,32], index: 1, kind: input, shape index: {}]   ;;  %s129_s2 = inlined_call_operand.hbm [shape: f32[2,8,32], index: 2, kind: output, shape index: {}, may-alias: {0,2}]  }
   0x1   :  { %8 = vsyncpa [#allocation4], 0  ;;  %s99_s9 = smov [#allocation2]  }
   0x2   :  { %s14_s10 = sshll.u32 %s99_s9, 4  ;;  %s15_s10 = int_to_ptr.vmem [resolvable:$true] %s14_s10 }
   0x3   :  { %s63_s11 = scalar_lea.vmem %s15_s10, 256  ;;  %p68_p1 = scmp.lt.s32.totalorder %s15_s10, %s15_s10 }
   0x4   :  { %p64_p0 = scmp.ne.s32.totalorder %s15_s10, %s63_s11  ;;  %p69_p2 = scmp.lt.s32.totalorder %s63_s11, %s63_s11 }
   0x6   :  { %p70_p3 = por %p69_p2, %p68_p1 }
   0x8   :  { %p71_p4 = pnand %p70_p3, %p64_p0 }
   0xa   :  { %74 = shalt.err (!%p71_p4)
}
   0xb   :  { %s100_s12 = smov 128   ;;  %s101_s13 = smov 8  }
   0xc   :  { %20 = dma.hbm_to_vmem [thread:$0]  %s127_s0, 256, %s15_s10, [#allocation3], %s100_s12, %s100_s12, %s101_s13  }
   0xd   :  { %95 = dma.done.wait [#allocation3], 256  }
   0xe   :  { %96 = vsyncadd [#allocation3], 4294967040  ;;  %s102_s16 = smov [#allocation5]   ;;  %v26_v0 = vld [vmem:[#allocation2] sm:$0xff]  ;;  %vm31_vm0 = vcmask 261120   ;;  %v27_v2 = vld [vmem:[#allocation2 + $0x8] sm:$0xff] }
   0xf   :  { %s39_s17 = sshll.u32 %s102_s16, 4  ;;  %v28_v1 = vld [vmem:[%s128_s1] sm:$0xff]  ;;  %s40_s17 = int_to_ptr.vmem [resolvable:$true] %s39_s17 }
  0x10   :  { %v29_v3 = vadd.f32 %v28_v1, %v26_v0  ;;  %v30_v4 = vadd.f32 %v28_v1, %v27_v2  ;;  %s75_s20 = scalar_lea.vmem %s40_s17, 256  ;;  %p80_p6 = scmp.lt.s32.totalorder %s40_s17, %s40_s17 }
  0x11   :  { %p76_p5 = scmp.ne.s32.totalorder %s40_s17, %s75_s20  ;;  %p81_p7 = scmp.lt.s32.totalorder %s75_s20, %s75_s20 }
  0x12   :  { %32 = vst.msk [vmem:[#allocation5] sm:$0xff] %vm31_vm0, %v29_v3  ;;  %33 = vst.msk [vmem:[#allocation5 + $0x8] sm:$0xff] %vm31_vm0, %v30_v4 }
  0x13   :  { %p82_p8 = por %p81_p7, %p80_p6 }
  0x15   :  { %p83_p9 = pnand %p82_p8, %p76_p5 }
  0x17   :  { %86 = shalt.err (!%p83_p9)
}
  0x18   :  { %45 = dma.vmem_to_hbm [thread:$0]  %s40_s17, 256, %s129_s2, [#allocation4], %s100_s12, %s100_s12, %s101_s13  }
  0x19   :  { %97 = dma.done.wait [#allocation4], 256  }
  0x1a   :  { %98 = vsyncadd [#allocation4], 4294967040 }
  0x1b   :  { %49 = vsyncpa [#allocation3], 1 }
  0x1c   :  { %50 = vsyncpa [#allocation4], 1 }

</bundles_post_ra>
